<compile_context>
chip_gen: v7x
topology: tpu7x:2x2x1
jax: 0.10.0
libtpu: 0.0.40
codegen_flags: <defaults>
</compile_context>

<pallas_src>
import jax
import jax.numpy as jnp
from jax.experimental import pallas as pl
from jax.experimental.pallas import tpu as pltpu

LN_EPS = 1e-5  # torch.nn.LayerNorm default


# ===================== Pallas kernel =====================

def _poswise_ffn_kernel(x_ref, w1_ref, w2_ref, o_ref, acc_ref):
    """One (b, s, k) grid step: acc += relu(x @ W1[:, k]) @ W2[k, :];
    at the last k: residual add + LayerNorm + store."""
    k = pl.program_id(2)

    @pl.when(k == 0)
    def _():
        acc_ref[...] = jnp.zeros_like(acc_ref)

    x = x_ref[0]                                                        # (TS, D) compute dtype
    h = jnp.dot(x, w1_ref[...], preferred_element_type=jnp.float32)    # (TS, TFF) f32 on MXU
    h = jnp.maximum(h, 0.0).astype(w2_ref.dtype)                       # ReLU, back to MXU dtype
    acc_ref[...] += jnp.dot(h, w2_ref[...], preferred_element_type=jnp.float32)

    @pl.when(k == pl.num_programs(2) - 1)
    def _():
        y = acc_ref[...] + x_ref[0].astype(jnp.float32)                # residual, f32
        inv_d = 1.0 / y.shape[-1]
        s1 = jnp.sum(y, axis=-1, keepdims=True)                        # single-pass LN stats
        s2 = jnp.sum(y * y, axis=-1, keepdims=True)
        mu = s1 * inv_d
        var = jnp.maximum(s2 * inv_d - mu * mu, 0.0)
        o_ref[0] = ((y - mu) * jax.lax.rsqrt(var + LN_EPS)).astype(o_ref.dtype)


# ===================== wrapper =====================

def _largest_divisor_tile(dim, preferred, align):
    """Largest t <= preferred with dim % t == 0 and t % align == 0 (else dim)."""
    if dim <= preferred:
        return dim
    t = (preferred // align) * align
    while t >= align:
        if dim % t == 0:
            return t
        t -= align
    return dim  # fall back: whole dim is always a legal block


def poswise_ffn(x, w1, w2, *, compute_dtype=jnp.bfloat16, block_s=None, block_ff=None):
    """x: (B, S, d_model); w1: (d_model, d_ff); w2: (d_ff, d_model).
    Weights stored as (in, out), i.e. transpose of PyTorch Linear.weight — same math."""
    B, S, D = x.shape
    d_ff = w1.shape[1]
    assert w1.shape == (D, d_ff) and w2.shape == (d_ff, D)

    ts = block_s if block_s is not None else _largest_divisor_tile(S, 256, 8)
    tff = block_ff if block_ff is not None else _largest_divisor_tile(d_ff, 512, 128)
    assert S % ts == 0 and d_ff % tff == 0

    # bf16 MXU operands (full-rate matmul, half the DMA bytes); f32 also supported.
    xc = x.astype(compute_dtype)
    w1c = w1.astype(compute_dtype)
    w2c = w2.astype(compute_dtype)

    # VMEM budget: double-buffered x/out/weight tiles + f32 accumulator, with headroom.
    itm = jnp.dtype(compute_dtype).itemsize
    oitm = jnp.dtype(x.dtype).itemsize
    vmem_est = (2 * ts * D * itm + 2 * (D * tff + tff * D) * itm
                + 2 * ts * D * oitm + ts * D * 4)
    vmem_limit = min(max(2 * vmem_est, 32 * 1024 * 1024), 48 * 1024 * 1024)

    grid = (B, S // ts, d_ff // tff)  # reduction axis last

    return pl.pallas_call(
        _poswise_ffn_kernel,
        out_shape=jax.ShapeDtypeStruct((B, S, D), x.dtype),
        grid_spec=pltpu.PrefetchScalarGridSpec(
            num_scalar_prefetch=0,
            grid=grid,
            in_specs=[
                # activation tile: constant across the d_ff reduction axis
                pl.BlockSpec((1, ts, D), lambda b, s, k: (b, s, 0)),
                # weight tiles: constant across (b, s), stepped only by k
                pl.BlockSpec((D, tff), lambda b, s, k: (0, k)),
                pl.BlockSpec((tff, D), lambda b, s, k: (k, 0)),
            ],
            out_specs=pl.BlockSpec((1, ts, D), lambda b, s, k: (b, s, 0)),
            scratch_shapes=[pltpu.VMEM((ts, D), jnp.float32)],
        ),
        compiler_params=pltpu.CompilerParams(
            dimension_semantics=("parallel", "parallel", "arbitrary"),
            vmem_limit_bytes=vmem_limit,
        ),
    )(xc, w1c, w2c)


# ===================== reference (pure JAX, f32) =====================

def poswise_ffn_ref(x, w1, w2):
    h = jnp.maximum(x @ w1, 0.0)
    y = h @ w2 + x
    mu = jnp.mean(y, axis=-1, keepdims=True)
    var = jnp.mean(jnp.square(y - mu), axis=-1, keepdims=True)
    return (y - mu) * jax.lax.rsqrt(var + LN_EPS)


if __name__ == "__main__":
    # Small shapes consistent with forward(): [batch_size, seq_len, d_model].
    # d_model=128 keeps the output lane-dense; block_s/block_ff chosen so the
    # test exercises both the S tiling and the multi-step d_ff reduction.
    BATCH, SEQ, D_MODEL, D_FF = 2, 16, 128, 256

    key = jax.random.PRNGKey(0)
    kx, k1, k2 = jax.random.split(key, 3)
    x = jax.random.normal(kx, (BATCH, SEQ, D_MODEL), jnp.float32)
    w1 = 0.05 * jax.random.normal(k1, (D_MODEL, D_FF), jnp.float32)
    w2 = 0.05 * jax.random.normal(k2, (D_FF, D_MODEL), jnp.float32)

    ref = poswise_ffn_ref(x, w1, w2)

    # f32 compute path: exact check of the tiling / accumulator / LN logic.
    out_f32 = jax.block_until_ready(
        poswise_ffn(x, w1, w2, compute_dtype=jnp.float32, block_s=8, block_ff=128))
    assert out_f32.shape == (BATCH, SEQ, D_MODEL)
    assert bool(jnp.all(jnp.isfinite(out_f32)))
    assert bool(jnp.max(jnp.abs(out_f32 - ref)) < 1e-4), "f32 path mismatch vs reference"

    # bf16 MXU-operand path (production fast path): looser tolerance from bf16 rounding.
    out_bf16 = jax.block_until_ready(
        poswise_ffn(x, w1, w2, compute_dtype=jnp.bfloat16, block_s=8, block_ff=128))
    assert out_bf16.shape == (BATCH, SEQ, D_MODEL)
    assert bool(jnp.all(jnp.isfinite(out_bf16)))
    assert bool(jnp.max(jnp.abs(out_bf16 - ref)) < 5e-2), "bf16 path mismatch vs reference"

    print("KERNEL_OK")
</pallas_src>

<mosaic_0001>
module attributes {stable_mosaic.version = 11 : i64} {
  func.func @_poswise_ffn_kernel(%arg0: i32, %arg1: i32, %arg2: i32, %arg3: memref<1x8x128xf32, #tpu.memory_space<vmem>>, %arg4: memref<128x128xf32, #tpu.memory_space<vmem>>, %arg5: memref<128x128xf32, #tpu.memory_space<vmem>>, %arg6: memref<1x8x128xf32, #tpu.memory_space<vmem>>, %arg7: memref<8x128xf32, #tpu.memory_space<vmem>>) attributes {dimension_semantics = [#tpu.dimension_semantics<parallel>, #tpu.dimension_semantics<parallel>, #tpu.dimension_semantics<arbitrary>], iteration_bounds = array<i64: 2, 2, 2>, scalar_prefetch = 0 : i64, scratch_operands = 1 : i64, tpu.core_type = #tpu.core_type<tc>, window_params = [{transform_indices = @transform_0, window_bounds = array<i64: 1, 8, 128>}, {transform_indices = @transform_1, window_bounds = array<i64: 128, 128>}, {transform_indices = @transform_2, window_bounds = array<i64: 128, 128>}, {transform_indices = @transform_3, window_bounds = array<i64: 1, 8, 128>}]} {
    %c0_i32 = arith.constant 0 : i32
    %0 = arith.cmpi eq, %arg2, %c0_i32 : i32
    %1 = arith.extui %0 : i1 to i32
    %c0_i32_0 = arith.constant 0 : i32
    %2 = arith.cmpi ne, %1, %c0_i32_0 : i32
    scf.if %2 {
      %cst_14 = arith.constant 0.000000e+00 : f32
      %17 = vector.broadcast %cst_14 : f32 to vector<8x128xf32>
      %c0_15 = arith.constant 0 : index
      %c0_16 = arith.constant 0 : index
      %18 = vector.load %arg7[%c0_15, %c0_16] : memref<8x128xf32, #tpu.memory_space<vmem>>, vector<8x128xf32>
      tpu.vector_store %arg7[%c0_15, %c0_16], %17 {strides = array<i32>} : memref<8x128xf32, #tpu.memory_space<vmem>>, vector<8x128xf32>,
    } else {
    }
    %c0 = arith.constant 0 : index
    %c0_1 = arith.constant 0 : index
    %c0_2 = arith.constant 0 : index
    %3 = vector.load %arg3[%c0, %c0_1, %c0_2] : memref<1x8x128xf32, #tpu.memory_space<vmem>>, vector<1x8x128xf32>
    %4 = vector.shape_cast %3 : vector<1x8x128xf32> to vector<8x128xf32>
    %c0_3 = arith.constant 0 : index
    %c0_4 = arith.constant 0 : index
    %5 = vector.load %arg4[%c0_3, %c0_4] : memref<128x128xf32, #tpu.memory_space<vmem>>, vector<128x128xf32>
    %cst = arith.constant dense<0.000000e+00> : vector<8x128xf32>
    %6 = tpu.matmul %4, %5, %cst {dimension_numbers = #tpu.dot_dimension_numbers<[1], [0], [0], [1], [0, 0, 1, 1], [], []>} : vector<8x128xf32>, vector<128x128xf32>, vector<8x128xf32> -> vector<8x128xf32>
    %cst_5 = arith.constant 0.000000e+00 : f32
    %7 = vector.broadcast %cst_5 : f32 to vector<8x128xf32>
    %8 = arith.maximumf %6, %7 : vector<8x128xf32>
    %c0_6 = arith.constant 0 : index
    %c0_7 = arith.constant 0 : index
    %9 = vector.load %arg7[%c0_6, %c0_7] : memref<8x128xf32, #tpu.memory_space<vmem>>, vector<8x128xf32>
    %c0_8 = arith.constant 0 : index
    %c0_9 = arith.constant 0 : index
    %10 = vector.load %arg5[%c0_8, %c0_9] : memref<128x128xf32, #tpu.memory_space<vmem>>, vector<128x128xf32>
    %cst_10 = arith.constant dense<0.000000e+00> : vector<8x128xf32>
    %11 = tpu.matmul %8, %10, %cst_10 {dimension_numbers = #tpu.dot_dimension_numbers<[1], [0], [0], [1], [0, 0, 1, 1], [], []>} : vector<8x128xf32>, vector<128x128xf32>, vector<8x128xf32> -> vector<8x128xf32>
    %12 = arith.addf %9, %11 : vector<8x128xf32>
    %c0_11 = arith.constant 0 : index
    %c0_12 = arith.constant 0 : index
    %13 = vector.load %arg7[%c0_11, %c0_12] : memref<8x128xf32, #tpu.memory_space<vmem>>, vector<8x128xf32>
    tpu.vector_store %arg7[%c0_11, %c0_12], %12 {strides = array<i32>} : memref<8x128xf32, #tpu.memory_space<vmem>>, vector<8x128xf32>,
    %c1_i32 = arith.constant 1 : i32
    %14 = arith.cmpi eq, %arg2, %c1_i32 : i32
    %15 = arith.extui %14 : i1 to i32
    %c0_i32_13 = arith.constant 0 : i32
    %16 = arith.cmpi ne, %15, %c0_i32_13 : i32
    scf.if %16 {
      %c0_14 = arith.constant 0 : index
      %c0_15 = arith.constant 0 : index
      %17 = vector.load %arg7[%c0_14, %c0_15] : memref<8x128xf32, #tpu.memory_space<vmem>>, vector<8x128xf32>
      %c0_16 = arith.constant 0 : index
      %c0_17 = arith.constant 0 : index
      %c0_18 = arith.constant 0 : index
      %18 = vector.load %arg3[%c0_16, %c0_17, %c0_18] : memref<1x8x128xf32, #tpu.memory_space<vmem>>, vector<1x8x128xf32>
      %19 = vector.shape_cast %18 : vector<1x8x128xf32> to vector<8x128xf32>
      %20 = arith.addf %17, %19 : vector<8x128xf32>
      %cst_19 = arith.constant dense<0.000000e+00> : vector<8xf32>
      %21 = vector.multi_reduction <add>, %20, %cst_19 [1] : vector<8x128xf32> to vector<8xf32>
      %22 = vector.shape_cast %21 : vector<8xf32> to vector<8x1xf32>
      %23 = arith.mulf %20, %20 : vector<8x128xf32>
      %cst_20 = arith.constant dense<0.000000e+00> : vector<8xf32>
      %24 = vector.multi_reduction <add>, %23, %cst_20 [1] : vector<8x128xf32> to vector<8xf32>
      %25 = vector.shape_cast %24 : vector<8xf32> to vector<8x1xf32>
      %cst_21 = arith.constant 7.812500e-03 : f32
      %26 = vector.broadcast %cst_21 : f32 to vector<8x1xf32>
      %27 = arith.mulf %22, %26 : vector<8x1xf32>
      %cst_22 = arith.constant 7.812500e-03 : f32
      %28 = vector.broadcast %cst_22 : f32 to vector<8x1xf32>
      %29 = arith.mulf %25, %28 : vector<8x1xf32>
      %30 = arith.mulf %27, %27 : vector<8x1xf32>
      %31 = arith.subf %29, %30 : vector<8x1xf32>
      %cst_23 = arith.constant 0.000000e+00 : f32
      %32 = vector.broadcast %cst_23 : f32 to vector<8x1xf32>
      %33 = arith.maximumf %31, %32 : vector<8x1xf32>
      %34 = vector.broadcast %27 : vector<8x1xf32> to vector<8x128xf32>
      %35 = arith.subf %20, %34 : vector<8x128xf32>
      %cst_24 = arith.constant 9.99999974E-6 : f32
      %36 = vector.broadcast %cst_24 : f32 to vector<8x1xf32>
      %37 = arith.addf %33, %36 : vector<8x1xf32>
      %38 = math.rsqrt %37 : vector<8x1xf32>
      %39 = vector.broadcast %38 : vector<8x1xf32> to vector<8x128xf32>
      %40 = arith.mulf %35, %39 : vector<8x128xf32>
      %c0_25 = arith.constant 0 : index
      %c0_26 = arith.constant 0 : index
      %c0_27 = arith.constant 0 : index
      %41 = vector.load %arg6[%c0_25, %c0_26, %c0_27] : memref<1x8x128xf32, #tpu.memory_space<vmem>>, vector<1x8x128xf32>
      %42 = vector.shape_cast %41 : vector<1x8x128xf32> to vector<8x128xf32>
      %43 = vector.shape_cast %40 : vector<8x128xf32> to vector<1x8x128xf32>
      tpu.vector_store %arg6[%c0_25, %c0_26, %c0_27], %43 {strides = array<i32>} : memref<1x8x128xf32, #tpu.memory_space<vmem>>, vector<1x8x128xf32>,
    } else {
    }
    return
  }
  func.func @transform_0(%arg0: i32, %arg1: i32, %arg2: i32) -> (i32, i32, i32) {
    %c0_i32 = arith.constant 0 : i32
    %c0_i32_0 = arith.constant 0 : i32
    return %arg0, %arg1, %c0_i32 : i32, i32, i32
  }
  func.func @transform_1(%arg0: i32, %arg1: i32, %arg2: i32) -> (i32, i32) {
    %c0_i32 = arith.constant 0 : i32
    %c0_i32_0 = arith.constant 0 : i32
    return %c0_i32, %arg2 : i32, i32
  }
  func.func @transform_2(%arg0: i32, %arg1: i32, %arg2: i32) -> (i32, i32) {
    %c0_i32 = arith.constant 0 : i32
    %c0_i32_0 = arith.constant 0 : i32
    return %arg2, %c0_i32 : i32, i32
  }
  func.func @transform_3(%arg0: i32, %arg1: i32, %arg2: i32) -> (i32, i32, i32) {
    %c0_i32 = arith.constant 0 : i32
    %c0_i32_0 = arith.constant 0 : i32
    return %arg0, %arg1, %c0_i32 : i32, i32, i32
  }
}

</mosaic_0001>

<bundles_post_ra>
// kernel: tpu_custom_call.1
= control target key start
LH: loop header
LB: loop body
LE: loop exit
PB: predicated region body
PF: predicated region fallthrough
CT: control target
= control target key end

     0   :  { %s1655_s0 = inlined_call_operand.hbm [shape: f32[2,16,128], index: 0, kind: input, shape index: {}]   ;;  %s1656_s1 = inlined_call_operand.hbm [shape: f32[128,256], index: 1, kind: input, shape index: {}]   ;;  %s1657_s2 = inlined_call_operand.hbm [shape: f32[256,128], index: 2, kind: input, shape index: {}]   ;;  %s1658_s3 = inlined_call_operand.hbm [shape: f32[2,16,128], index: 3, kind: output, shape index: {}]  }
   0x1   :  { %1676 = sst [smem:[#allocation25_spill]] %s1656_s1 }
   0x2   :  { %1677 = sst [smem:[#allocation26_spill]] %s1658_s3 }
   0x3   :  { %8 = vsyncpa [#allocation4], 0 }
   0x4   :  { %10 = vsyncpa [#allocation4 + $0x1], 0 }
   0x5   :  { %11 = vsyncpa [#allocation7], 0 }
   0x6   :  { %13 = vsyncpa [#allocation7 + $0x1], 0 }
   0x7   :  { %14 = vsyncpa [#allocation5], 0 }
   0x8   :  { %16 = vsyncpa [#allocation5 + $0x1], 0  ;;  %s1221_s12 = smov 0   ;;  %s1223_s13 = smov 0  }
   0x9   :  { %s1225_s14 = smov 0   ;;  %s1227_s15 = smov 0  }
   0xa   :  { %s1229_s16 = smov 0   ;;  %s1231_s17 = smov 0  }
   0xb   :  { %s1233_s18 = smov 0   ;;  %s1235_s19 = smov 0  }
   0xc   :  { %s1237_s20 = smov 0   ;;  %s1239_s21 = smov 0  }
   0xd   :  { %s1241_s22 = smov 0   ;;  %s1243_s23 = smov 0  }
   0xe   :  { %s1245_s24 = smov 0  }
   0xf LB: > { %1678 = sst [smem:[#allocation13_spill]] %s1148_s14  ;;  %p58_p0 = scmp.eq.s32.totalorder %s1188_s24, 0  ;;  %s1188_s24 = sphi %s1245_s24, %s22_s24   ;;  %s1184_s23 = sphi %s1243_s23, %s1724_s23   ;;  %s1180_s22 = sphi %s1241_s22, %s1723_s22   ;;  %s1176_s21 = sphi %s1239_s21, %s1722_s21   ;;  %s1172_s20 = sphi %s1237_s20, %s1721_s20   ;;  %s1168_s19 = sphi %s1235_s19, %s1720_s19   ;;  %s1164_s18 = sphi %s1233_s18, %s1719_s18   ;;  %s1160_s17 = sphi %s1231_s17, %s1729_s17   ;;  %s1156_s16 = sphi %s1229_s16, %s1728_s16   ;;  %s1152_s15 = sphi %s1227_s15, %s1727_s15   ;;  %s1148_s14 = sphi %s1225_s14, %s1718_s14   ;;  %s1144_s13 = sphi %s1223_s13, %s1726_s13   ;;  %s1140_s12 = sphi %s1221_s12, %s1725_s12  }
  0x10   : > { %1679 = sst [smem:[#allocation14_spill]] %s1164_s18  ;;  %p83_p1 = scmp.ne.s32.totalorder %s1148_s14, %s1144_s13 }
  0x11   : > { %1680 = sst [smem:[#allocation15_spill]] %s1168_s19  ;;  %p1659_p2 = scmp.lt.s32.totalorder %s1188_s24, 8 }
  0x12   : > { %1681 = sst [smem:[#allocation16_spill]] %s1172_s20  ;;  %s187_s26 = sand.u32 1, %s1188_s24  }
  0x13   : > { %1682 = sst [smem:[#allocation17_spill]] %s1176_s21  ;;  %p85_p3 = por %p83_p1, %p58_p0 }
  0x14   : > { %1683 = sst [smem:[#allocation18_spill]] %s1180_s22  ;;  %s189_s27 = sand.u32 1, %s1148_s14  }
  0x15   : > { %1684 = sst [smem:[#allocation19_spill]] %s1184_s23  ;;  %s650_s28 = sshll.u32 %s1176_s21, 7 }
  0x16   : > { %s1296_s29 = sshll.u32 %s189_s27, 7  ;;  %s1685_s1 = sld [smem:[#allocation25_spill]] }
  0x17   : > { %p1305_p4 = pnand %p1659_p2, %p85_p3  ;;  %s191_s7 = scalar_lea.vmem [#allocation6], %s1296_s29 }
  0x18   : > { %s197_s8 = sshll.u32 %s191_s7, 4  ;;  %s1312_s9 = scalar_lea.sflag [#allocation7], %s187_s26  ;;  %s1310_s8 = int_to_ptr.vmem [resolvable:$true] %s197_s8 }
  0x19   : > { %p1665_p6 = pneg %p1305_p4 }
  0x1c   : > { %s1301_s5 = scalar_lea.hbm %s1685_s1, %s650_s28  ;;  %s961_s28 = scalar_lea.hbm %s1685_s1, 4096 }
  0x1d   : > { %s956_s10 = scalar_lea.hbm %s1301_s5, 2048  ;;  %p962_p9 = scmp.lt.u32.totalorder %s1301_s5, %s1685_s1 }
  0x1e   : > { %p957_p5 = scmp.ne.s32.totalorder %s1301_s5, %s956_s10  ;;  %p963_p10 = scmp.lt.u32.totalorder %s961_s28, %s956_s10 }
  0x1f   : > { %p965_p12 = scmp.lt.u32.totalorder %s956_s10, %s1301_s5 }
  0x20   : > { %p959_p7 = pnand %p1665_p6, %p957_p5  ;;  %p964_p11 = por %p963_p10, %p962_p9 }
  0x22   : > { %p960_p8 = pneg %p959_p7  ;;  %p966_p13 = por %p965_p12, %p964_p11 }
  0x24   : > { %p967_p1 = pnand %p966_p13, %p960_p8 }
  0x26   : > { %970 = shalt.err (!%p967_p1)
}
  0x27   : > { %s971_s26 = scalar_lea.vmem %s1310_s8, 2048  ;;  %s1190_s7 = smov [#allocation6]  }
  0x28   : > { %p972_p3 = scmp.ne.s32.totalorder %s1310_s8, %s971_s26  ;;  %s976_s11 = sshll.u32 %s1190_s7, 4  ;;  %s977_s11 = int_to_ptr.vmem [resolvable:$false] %s976_s11 }
  0x29   : > { %s978_s27 = scalar_lea.vmem %s977_s11, 4096  ;;  %p979_p2 = scmp.lt.s32.totalorder %s1310_s8, %s977_s11 }
  0x2a   : > { %p974_p5 = pnand %p972_p3, %p1665_p6  ;;  %p980_p9 = scmp.lt.s32.totalorder %s978_s27, %s971_s26 }
  0x2c   : > { %p975_p7 = pneg %p974_p5  ;;  %p981_p10 = por %p980_p9, %p979_p2 }
  0x2e   : > { %p982_p11 = pnand %p981_p10, %p975_p7 }
  0x30   : > { %985 = shalt.err (!%p982_p11)
}
  0x31   : > { %s1191_s10 = smov 256   ;;  %s1660_s28 = smov 128  }
  0x32   : > { %s1661_s30 = smov 8   ;;  %p654_p2 = scmp.ge.s32.totalorder %s1188_s24, 1 }
  0x33   : > { %833 = dma.hbm_to_vmem [thread:$0]  (!%p1305_p4), %s1301_s5, 2048, %s1310_s8, %s1312_s9, %s1191_s10, %s1660_s28, %s1661_s30  }
  0x34   : > { %p226_p8 = scmp.lt.s32.totalorder %s1188_s24, 9  ;;  %s1349_s26 = sadd.s32 4294967295, %s1188_s24  }
  0x35   : > { %s643_s7 = sadd.s32 4294967294, %s1188_s24   ;;  %s34_s11 = sadd.s32 1, %s1176_s21 }
  0x36   : > { %p1344_p12 = pnand %p654_p2, %p226_p8  ;;  %p35_p13 = scmp.ge.s32.totalorder %s34_s11, 2 }
  0x37   : > { %s37_s5 = sadd.s32 1, %s1180_s22  ;;  %s41_s8 = sadd.s32 1, %s1184_s23 }
  0x38   : > { %s1687_s4 = scalar_select %p1344_p12, 1, 0 }
  0x39   : > { %s50_s27 = sadd.s32 1, %s1160_s17  ;;  %s1731_s11 = smov (%p35_p13, %s34_s11), 0 }
  0x3a   : > { %1688 = sst [smem:[#allocation20_spill]] %s1731_s11  ;;  %s1733_s5 = smov (!%p35_p13, %s37_s5), %s1180_s22 }
  0x3b   : > { %p57_p1 = scmp.ne.s32.totalorder %s1160_s17, %s1156_s16  ;;  %p63_p3 = scmp.ne.s32.totalorder %s1156_s16, %s1152_s15 }
  0x3c   : > { %p39_p5 = scmp.ge.s32.totalorder %s1733_s5, 2  ;;  %p64_p7 = scmp.eq.s32.totalorder %s1349_s26, 0 }
  0x3d   : > { %p1369_p9 = por %p58_p0, %p57_p1  ;;  %s73_s28 = ssub.s32 %s1176_s21, %s1731_s11 }
  0x3e   : > { %s1735_s5 = smov (%p39_p5, %s1733_s5), 0  ;;  %s1737_s8 = smov (!%p39_p5, %s41_s8), %s1184_s23 }
  0x3f   : > { %1690 = sst [smem:[#allocation21_spill]] %s1735_s5  ;;  %s46_s30 = ssub.s32 %s1180_s22, %s1735_s5 }
  0x40   : > { %p1385_p10 = por %p64_p7, %p63_p3  ;;  %p43_p0 = scmp.ge.s32.totalorder %s1737_s8, 2 }
  0x41   : > { %p74_p11 = scmp.eq.s32.totalorder %s73_s28, 0  ;;  %p89_p2 = scmp.ne.s32.totalorder %s1144_s13, %s1140_s12 }
  0x42   : > { %s1691_s25 = scalar_select %p1385_p10, 1, 0 }
  0x43   : > { %p141_p8 = scmp.eq.s32.totalorder %s1349_s26, 7  ;;  %s1739_s8 = smov (%p43_p0, %s1737_s8), 0 }
  0x44   : > { %1692 = sst [smem:[#allocation22_spill]] %s1739_s8  ;;  %s1693_s1 = sadd.s32 1, %s1148_s14 }
  0x45   : > { %s1397_s11 = scalar_select %p74_p11, %s1148_s14, %s1693_s1  }
  0x46   : > { %s45_s5 = ssub.s32 %s1184_s23, %s1739_s8  ;;  %p1403_p13 = por %p89_p2, %p64_p7 }
  0x47   : > { %1694 = sst [smem:[#allocation23_spill]] %s1397_s11  ;;  %s47_s19 = sor.u32 %s46_s30, %s45_s5 }
  0x48   : > { %s1695_s3 = scalar_select %p1403_p13, 1, 0 }
  0x49   : > { %p1410_p5 = por %p141_p8, %p57_p1  ;;  %p48_p0 = scmp.eq.s32.totalorder %s47_s19, 0 }
  0x4a   : > { %1696 = sst [smem:[#allocation24_spill]] %s1695_s3  ;;  %p147_p6 = scmp.eq.s32.totalorder %s643_s7, 7 }
  0x4b   : > { %s1697_s12 = scalar_select %p1410_p5, 1, 0 }
  0x4c   : > { %s167_s28 = sand.u32 1, %s1160_s17   ;;  %s647_s1 = sshll.u32 %s1184_s23, 1 }
  0x4d   : > { %s1417_s11 = scalar_select %p48_p0, %s1160_s17, %s50_s27  }
  0x4e   : > { %p1422_p7 = por %p147_p6, %p63_p3  ;;  %s646_s14 = sshll.u32 %s167_s28, 3 }
  0x4f   : > { %s176_s20 = sadd.s32 %s1180_s22, %s647_s1  ;;  %s171_s19 = scalar_lea.vmem [#allocation3], %s646_s14 }
  0x50   : > { %s1698_s8 = scalar_select %p1422_p7, 1, 0 }
  0x51   : > { %s648_s30 = sshll.u32 %s176_s20, 7  ;;  %s180_s7 = sshll.u32 %s171_s19, 4  ;;  %s1432_s7 = int_to_ptr.vmem [resolvable:$true] %s180_s7 }
  0x52   : > { %s1430_s3 = scalar_lea.hbm %s1655_s0, %s648_s30  ;;  %p1699_p6 = scmp.lt.s32.totalorder %s1188_s24, 8 }
  0x53   : > { %s666_s20 = sshll.u32 %s1176_s21, 11  ;;  %s168_s5 = scalar_lea.sflag [#allocation4], %s167_s28 }
  0x54   : > { %p1438_p1 = pnand %p1699_p6, %p1369_p9  ;;  %s1446_s30 = scalar_lea.hbm %s1657_s2, %s666_s20 }
  0x55   : > { %s986_s14 = scalar_lea.hbm %s1430_s3, 128  ;;  %s991_s23 = scalar_lea.hbm %s1655_s0, 512 }
  0x56   : > { %p987_p3 = scmp.ne.s32.totalorder %s1430_s3, %s986_s14  ;;  %p988_p11 = pneg %p1438_p1 }
  0x57   : > { %p992_p8 = scmp.lt.u32.totalorder %s1430_s3, %s1655_s0  ;;  %p993_p0 = scmp.lt.u32.totalorder %s991_s23, %s986_s14 }
  0x58   : > { %p989_p2 = pnand %p988_p11, %p987_p3  ;;  %p995_p7 = scmp.lt.u32.totalorder %s986_s14, %s1430_s3 }
  0x59   : > { %p994_p6 = por %p993_p0, %p992_p8 }
  0x5a   : > { %p990_p9 = pneg %p989_p2 }
  0x5b   : > { %p996_p5 = por %p995_p7, %p994_p6 }
  0x5d   : > { %p997_p13 = pnand %p996_p5, %p990_p9 }
  0x5f   : > { %1000 = shalt.err (!%p997_p13)
}
  0x60   : > { %s1001_s28 = scalar_lea.vmem %s1432_s7, 128  ;;  %s1194_s20 = smov [#allocation3]  }
  0x61   : > { %p1002_p3 = scmp.ne.s32.totalorder %s1432_s7, %s1001_s28  ;;  %s1006_s18 = sshll.u32 %s1194_s20, 4  ;;  %s1007_s18 = int_to_ptr.vmem [resolvable:$false] %s1006_s18 }
  0x62   : > { %s1008_s21 = scalar_lea.vmem %s1007_s18, 256  ;;  %p1009_p12 = scmp.lt.s32.totalorder %s1432_s7, %s1007_s18 }
  0x63   : > { %p1004_p2 = pnand %p1002_p3, %p988_p11  ;;  %p1010_p8 = scmp.lt.s32.totalorder %s1008_s21, %s1001_s28 }
  0x65   : > { %p1005_p10 = pneg %p1004_p2  ;;  %p1011_p0 = por %p1010_p8, %p1009_p12 }
  0x67   : > { %p1012_p7 = pnand %p1011_p0, %p1005_p10 }
  0x69   : > { %1015 = shalt.err (!%p1012_p7)
}
  0x6a   : > { %830 = dma.hbm_to_vmem [thread:$0]  (!%p1438_p1), %s1430_s3, 128, %s1432_s7, %s168_s5  }
  0x6b   : > { %s211_s22 = scalar_lea.vmem [#allocation8], %s1296_s29  ;;  %s1016_s1 = scalar_lea.hbm %s1446_s30, 2048 }
  0x6c   : > { %s218_s23 = sshll.u32 %s211_s22, 4  ;;  %p1017_p13 = scmp.ne.s32.totalorder %s1446_s30, %s1016_s1  ;;  %s1474_s23 = int_to_ptr.vmem [resolvable:$true] %s218_s23 }
  0x6d   : > { %p1701_p12 = pneg %p1305_p4  ;;  %s1021_s10 = scalar_lea.hbm %s1657_s2, 4096 }
  0x6e   : > { %p1022_p11 = scmp.lt.u32.totalorder %s1446_s30, %s1657_s2  ;;  %p1023_p9 = scmp.lt.u32.totalorder %s1021_s10, %s1016_s1 }
  0x6f   : > { %p1019_p10 = pnand %p1017_p13, %p1701_p12  ;;  %p1025_p6 = scmp.lt.u32.totalorder %s1016_s1, %s1446_s30 }
  0x70   : > { %p1024_p1 = por %p1023_p9, %p1022_p11 }
  0x71   : > { %p1020_p5 = pneg %p1019_p10 }
  0x72   : > { %p1026_p3 = por %p1025_p6, %p1024_p1 }
  0x74   : > { %p1027_p2 = pnand %p1026_p3, %p1020_p5 }
  0x76   : > { %1030 = shalt.err (!%p1027_p2)
}
  0x77   : > { %s1031_s3 = scalar_lea.vmem %s1474_s23, 2048  ;;  %p1702_p0 = pmov %p1701_p12 }
  0x78   : > { %p1032_p8 = scmp.ne.s32.totalorder %s1474_s23, %s1031_s3  ;;  %s1195_s29 = smov [#allocation8]  }
  0x79   : > { %s1036_s7 = sshll.u32 %s1195_s29, 4  ;;  %s1037_s7 = int_to_ptr.vmem [resolvable:$false] %s1036_s7 }
  0x7a   : > { %p1034_p7 = pnand %p1032_p8, %p1702_p0  ;;  %s1038_s5 = scalar_lea.vmem %s1037_s7, 4096 }
  0x7b   : > { %p1039_p12 = scmp.lt.s32.totalorder %s1474_s23, %s1037_s7  ;;  %p1040_p10 = scmp.lt.s32.totalorder %s1038_s5, %s1031_s3 }
  0x7c   : > { %p1035_p13 = pneg %p1034_p7 }
  0x7d   : > { %p1041_p11 = por %p1040_p10, %p1039_p12 }
  0x7f   : > { %p1042_p9 = pnand %p1041_p11, %p1035_p13 }
  0x81   : > { %1045 = shalt.err (!%p1042_p9)
}
  0x82   : > { %s1703_s20 = smov 8   ;;  %s1704_s18 = smov 128  }
  0x83   : > { %836 = dma.hbm_to_vmem [thread:$0]  (!%p1305_p4), %s1446_s30, 2048, %s1474_s23, %s1312_s9, %s1704_s18, %s1704_s18, %s1703_s20  }
  0x84   : > { %p1705_p5 = scmp.ne.s32.totalorder %s1687_s4, 0 }
  0x85   : > { %s1506_s21 = sand.u32 (!%p1705_p5), 1, %s1156_s16   ;;  %p1706_p1 = scmp.ne.s32.totalorder (!%p1705_p5), %s1691_s25, 0 }
  0x86   : > { %230 = sbr.rel (%p1705_p5) target bundleno = 835 (0x343), region = 32  ;;  %s655_s22 = sshll.u32 (!%p1705_p5), %s1506_s21, 3 }
  0x87   : > { %s233_s1 = scalar_lea.sflag (!%p1705_p5), [#allocation4], %s1506_s21  ;;  %s1510_s27 = scalar_lea.vmem (!%p1705_p5), [#allocation3], %s655_s22 }
  0x8d   : > { %1127 = dma.done.wait (%p1706_p1), %s233_s1, 128  }
  0x8e   : > { %1129 = vsyncadd (%p1706_p1), %s233_s1, 4294967168  ;;  %s1707_s6 = sld [smem:[#allocation24_spill]]  ;;  %s241_s9 = sand.u32 1, %s1349_s26  }
  0x8f   : > { %s243_s4 = sand.u32 1, %s1144_s13   ;;  %s242_s23 = scalar_lea.sflag [#allocation7], %s241_s9 }
  0x90   : > { %s656_s30 = sshll.u32 %s243_s4, 7 }
  0x91   : > { %s1518_s14 = scalar_lea.vmem [#allocation6], %s656_s30 }
  0x94   : > { %p1708_p4 = scmp.ne.s32.totalorder %s1707_s6, 0 }
  0x96   : > { %1131 = dma.done.wait (%p1708_p4), %s242_s23, 4096  }
  0x97   : > { %1133 = vsyncadd (%p1708_p4), %s242_s23, 4294963200  ;;  %s1524_s10 = scalar_lea.vmem [#allocation8], %s656_s30  ;;  %s1526_s19 = scalar_lea.vmem [#allocation9], %s655_s22 }
  0x98   : > { %s1709_s25 = sld [smem:[#allocation14_spill]] }
  0x9e   : > { %p659_p6 = scmp.ne.s32.totalorder %s1709_s25, 0 }
  0x9f   : > { %v1196_v0 = vmov (!%p659_p6), 0.0  }
  0xa0   : > { %291 = sbr.rel (%p659_p6) target bundleno = 167 (0xa7), region = 48  ;;  %292 = vst [vmem:[#allocation2] sm:$0xff] (!%p659_p6), %v1196_v0 }
  0xa7 PF: > { %v294_v1 = vld [vmem:[%s1518_s14] sm:$0xff]  ;;  %v295_v2 = vld [vmem:[%s1518_s14 + $0x8] sm:$0xff]  ;;  %v296_v3 = vld [vmem:[%s1518_s14 + $0x10] sm:$0xff]  ;;  %v1197_v4 = vmov 0.0|0.0   ;;  %vm1198_vm0 = vmmov 0   ;;  %v1199_v7 = vmov 0.0  }
  0xa8   : > { %771 = vmatprep.subr.bf16.mxu0 %v1197_v4  ;;  %v772_v5 = vpack.c.bf16 %v295_v2, %v294_v1  ;;  %v297_v6 = vld [vmem:[%s1518_s14 + $0x18] sm:$0xff]  ;;  %733 = vmatprep.mubr.msk.f32.mxu0 %vm1198_vm0, %v1199_v7  ;;  %v298_v9 = vld [vmem:[%s1518_s14 + $0x20] sm:$0xff]  ;;  %v299_v10 = vld [vmem:[%s1518_s14 + $0x28] sm:$0xff]  ;;  %s1710_s26 = sld [smem:[#allocation14_spill]] }
  0xa9   : > { %795 = vmatprep.subr.bf16.mxu1 %v1197_v4  ;;  %768 = vmatprep.mubr.msk.f32.mxu1 %vm1198_vm0, %v1199_v7  ;;  %v775_v8 = vpack.c.bf16 %v297_v6, %v296_v3  ;;  %v382_v11 = vld [vmem:[%s1524_s10] sm:$0xff]  ;;  %v383_v12 = vld [vmem:[%s1524_s10 + $0x8] sm:$0xff]  ;;  %v384_v13 = vld [vmem:[%s1524_s10 + $0x10] sm:$0xff]  ;;  %v778_v15 = vpack.c.bf16 %v299_v10, %v298_v9 }
  0xaa   : > { %773 = vmatpush3.bf16.msra.mxu0 %v772_v5  ;;  %v385_v14 = vld [vmem:[%s1524_s10 + $0x18] sm:$0xff]  ;;  %v796_v16 = vpack.c.bf16 %v383_v12, %v382_v11  ;;  %v300_v17 = vld [vmem:[%s1518_s14 + $0x30] sm:$0xff]  ;;  %v386_v20 = vld [vmem:[%s1524_s10 + $0x20] sm:$0xff] }
  0xab   : > { %774 = vmatprep.subr.bf16.mxu0 %v1197_v4  ;;  %v301_v18 = vld [vmem:[%s1518_s14 + $0x38] sm:$0xff]  ;;  %v799_v19 = vpack.c.bf16 %v385_v14, %v384_v13  ;;  %v387_v21 = vld [vmem:[%s1524_s10 + $0x28] sm:$0xff]  ;;  %v302_v23 = vld [vmem:[%s1518_s14 + $0x40] sm:$0xff] }
  0xac   : > { %797 = vmatpush3.bf16.msra.mxu1 %v796_v16  ;;  %v781_v22 = vpack.c.bf16 %v301_v18, %v300_v17  ;;  %v303_v24 = vld [vmem:[%s1518_s14 + $0x48] sm:$0xff]  ;;  %v802_v25 = vpack.c.bf16 %v387_v21, %v386_v20  ;;  %v388_v26 = vld [vmem:[%s1524_s10 + $0x30] sm:$0xff]  ;;  %v389_v27 = vld [vmem:[%s1524_s10 + $0x38] sm:$0xff] }
  0xad   : > { %798 = vmatprep.subr.bf16.mxu1 %v1197_v4  ;;  %v784_v28 = vpack.c.bf16 %v303_v24, %v302_v23  ;;  %v304_v29 = vld [vmem:[%s1518_s14 + $0x50] sm:$0xff]  ;;  %v305_v30 = vld [vmem:[%s1518_s14 + $0x58] sm:$0xff]  ;;  %v805_v31 = vpack.c.bf16 %v389_v27, %v388_v26  ;;  %v390_v32 = vld [vmem:[%s1524_s10 + $0x40] sm:$0xff] }
  0xae   : > { %776 = vmatpush3.bf16.msra.mxu0 %v775_v8  ;;  %v391_v33 = vld [vmem:[%s1524_s10 + $0x48] sm:$0xff]  ;;  %v787_v34 = vpack.c.bf16 %v305_v30, %v304_v29  ;;  %v306_v35 = vld [vmem:[%s1518_s14 + $0x60] sm:$0xff]  ;;  %v392_v38 = vld [vmem:[%s1524_s10 + $0x50] sm:$0xff]  ;;  %p660_p3 = scmp.ne.s32.totalorder %s1710_s26, 1 }
  0xaf   : > { %777 = vmatprep.subr.bf16.mxu0 %v1197_v4  ;;  %v307_v36 = vld [vmem:[%s1518_s14 + $0x68] sm:$0xff]  ;;  %v808_v37 = vpack.c.bf16 %v391_v33, %v390_v32  ;;  %v393_v39 = vld [vmem:[%s1524_s10 + $0x58] sm:$0xff]  ;;  %v308_v41 = vld [vmem:[%s1518_s14 + $0x70] sm:$0xff] }
  0xb0   : > { %800 = vmatpush3.bf16.msra.mxu1 %v799_v19  ;;  %v790_v40 = vpack.c.bf16 %v307_v36, %v306_v35  ;;  %v309_v42 = vld [vmem:[%s1518_s14 + $0x78] sm:$0xff]  ;;  %v811_v43 = vpack.c.bf16 %v393_v39, %v392_v38  ;;  %v394_v44 = vld [vmem:[%s1524_s10 + $0x60] sm:$0xff]  ;;  %v395_v45 = vld [vmem:[%s1524_s10 + $0x68] sm:$0xff] }
  0xb1   : > { %801 = vmatprep.subr.bf16.mxu1 %v1197_v4  ;;  %v793_v46 = vpack.c.bf16 %v309_v42, %v308_v41  ;;  %v814_v47 = vpack.c.bf16 %v395_v45, %v394_v44  ;;  %v293_v48 = vld [vmem:[%s1510_s27] sm:$0xff]  ;;  %v381_v55 = vld [vmem:[#allocation2] sm:$0xff] }
  0xb2   : > { %779 = vmatpush3.bf16.msra.mxu0 %v778_v15  ;;  %v396_v49 = vld [vmem:[%s1524_s10 + $0x70] sm:$0xff]  ;;  %v397_v50 = vld [vmem:[%s1524_s10 + $0x78] sm:$0xff] }
  0xb3   : > { %780 = vmatprep.subr.bf16.mxu0 %v1197_v4  ;;  %v817_v51 = vpack.c.bf16 %v397_v50, %v396_v49  ;;  %v475_v60 = vld [vmem:[%s1510_s27] sm:$0xff] (!%p660_p3) }
  0xb4   : > { %803 = vmatpush3.bf16.msra.mxu1 %v802_v25 }
  0xb5   : > { %804 = vmatprep.subr.bf16.mxu1 %v1197_v4 }
  0xb6   : > { %782 = vmatpush3.bf16.msra.mxu0 %v781_v22 }
  0xb7   : > { %783 = vmatprep.subr.bf16.mxu0 %v1197_v4 }
  0xb8   : > { %806 = vmatpush3.bf16.msra.mxu1 %v805_v31 }
  0xb9   : > { %807 = vmatprep.subr.bf16.mxu1 %v1197_v4 }
  0xba   : > { %785 = vmatpush3.bf16.msra.mxu0 %v784_v28 }
  0xbb   : > { %786 = vmatprep.subr.bf16.mxu0 %v1197_v4 }
  0xbc   : > { %809 = vmatpush3.bf16.msra.mxu1 %v808_v37 }
  0xbd   : > { %810 = vmatprep.subr.bf16.mxu1 %v1197_v4 }
  0xbe   : > { %788 = vmatpush3.bf16.msra.mxu0 %v787_v34 }
  0xbf   : > { %789 = vmatprep.subr.bf16.mxu0 %v1197_v4 }
  0xc0   : > { %812 = vmatpush3.bf16.msra.mxu1 %v811_v43 }
  0xc1   : > { %813 = vmatprep.subr.bf16.mxu1 %v1197_v4 }
  0xc2   : > { %791 = vmatpush3.bf16.msra.mxu0 %v790_v40 }
  0xc3   : > { %792 = vmatprep.subr.bf16.mxu0 %v1197_v4 }
  0xc4   : > { %815 = vmatpush3.bf16.msra.mxu1 %v814_v47 }
  0xc5   : > { %816 = vmatprep.subr.bf16.mxu1 %v1197_v4 }
  0xc6   : > { %794 = vmatpush3.bf16.msra.mxu0 %v793_v46 }
  0xc8   : > { %818 = vmatpush3.bf16.msra.mxu1 %v817_v51 }
  0xc9   : > { %734 = vmatmul.mubr.f32.vlgmr.msra.gmra.mrb[0].mxu0 %v293_v48 }
 0x19c   : > { %v376_v52 = vpop.f32.mrb[0].mxu0 }
 0x19d   : > { %v380_v53 = vmax.f32 %v376_v52, 0.0  ;;  %v735_v54 = vpop.f32.mrb[1].mxu0 }
 0x19f   : > { %769 = vmatmul.mubr.f32.vlgmr.msra.gmra.mrb[0].mxu1 %v380_v53 }
 0x26f   : > { %473 = sbr.rel (%p660_p3) target bundleno = 807 (0x327), region = 52 }
 0x272   : > { %v464_v56 = vpop.f32.mrb[0].mxu1 }
 0x273   : > { %v468_v57 = vadd.f32 %v464_v56, %v381_v55  ;;  %v770_v58 = vpop.f32.mrb[1].mxu1 }
 0x275   : > { %469 = vst [vmem:[#allocation2] sm:$0xff] %v468_v57 }
 0x27c   : > { %v474_v59 = vld [vmem:[#allocation2] sm:$0xff] }
 0x27d   : > { %v476_v61 = vadd.f32 %v475_v60, %v474_v59 }
 0x27f   : > { %477 = vadd.xlane.f32.xlu0 %v476_v61  ;;  %v479_v62 = vmul.f32 %v476_v61, %v476_v61 }
 0x283   : > { %480 = vadd.xlane.f32.xlu0 %v479_v62 }
 0x30c   : > { %v478_v63 = vpop.xlane.xlu0 %477 }
 0x30d   : > { %v482_v0 = vmul.f32 0.0078125, %v478_v63 }
 0x30f   : > { %v484_v2 = vmul.f32 %v482_v0, %v482_v0  ;;  %v487_v7 = vsub.f32 %v476_v61, %v482_v0 }
 0x310   : > { %v481_v1 = vpop.xlane.xlu0 %480 }
 0x311   : > { %v483_v3 = vmul.f32 0.0078125, %v481_v1 }
 0x313   : > { %v485_v4 = vsub.f32 %v483_v3, %v484_v2 }
 0x315   : > { %v486_v5 = vmax.f32 %v485_v4, 0.0 }
 0x317   : > { %v488_v6 = vadd.f32 1e-05, %v486_v5 }
 0x319   : > { %954 = vrsqrt.f32 %v488_v6 }
 0x323   : > { %v955_v8 = vpop.eup %954 }
 0x324   : > { %v490_v9 = vmul.f32 %v955_v8, %v487_v7 }
 0x326   : > { %491 = vst [vmem:[%s1526_s19] sm:$0xff] %v490_v9 }
 0x327 PF: > { %s1711_s28 = sld [smem:[#allocation16_spill]]  ;;  %s1712_s3 = sld [smem:[#allocation15_spill]] }
 0x328   : > { %s508_s5 = sshll.u32 %s1526_s19, 4  ;;  %s1713_s1 = sld [smem:[#allocation26_spill]]  ;;  %s1584_s5 = int_to_ptr.vmem [resolvable:$true] %s508_s5 }
 0x329   : > { %s493_s6 = scalar_lea.sflag [#allocation5], %s1506_s21  ;;  %s1046_s9 = scalar_lea.vmem %s1584_s5, 128 }
 0x32a   : > { %p1047_p2 = scmp.ne.s32.totalorder %s1584_s5, %s1046_s9  ;;  %p1714_p8 = scmp.ne.s32.totalorder %s1697_s12, 0 }
 0x32b   : > { %s1200_s4 = smov [#allocation9]  }
 0x32c   : > { %p1048_p0 = pnand %p1047_p2, %p1714_p8  ;;  %s1050_s30 = sshll.u32 %s1200_s4, 4  ;;  %s1051_s30 = int_to_ptr.vmem [resolvable:$false] %s1050_s30 }
 0x32d   : > { %s662_s29 = sshll.u32 %s1711_s28, 1  ;;  %s1052_s23 = scalar_lea.vmem %s1051_s30, 256 }
 0x32e   : > { %s504_s7 = sadd.s32 %s1712_s3, %s662_s29  ;;  %p1049_p7 = pneg %p1048_p0 }
 0x32f   : > { %s663_s20 = sshll.u32 %s504_s7, 7  ;;  %p1053_p13 = scmp.lt.s32.totalorder %s1584_s5, %s1051_s30 }
 0x330   : > { %s506_s27 = scalar_lea.hbm %s1713_s1, %s663_s20  ;;  %p1054_p12 = scmp.lt.s32.totalorder %s1052_s23, %s1046_s9 }
 0x332   : > { %p1055_p10 = por %p1054_p12, %p1053_p13 }
 0x334   : > { %p1056_p11 = pnand %p1055_p10, %p1049_p7 }
 0x336   : > { %1059 = shalt.err (!%p1056_p11)
}
 0x337   : > { %s1060_s14 = scalar_lea.hbm %s506_s27, 128  ;;  %s1064_s19 = scalar_lea.hbm %s1713_s1, 512 }
 0x338   : > { %p1061_p9 = scmp.ne.s32.totalorder %s506_s27, %s1060_s14  ;;  %p1065_p4 = scmp.lt.u32.totalorder %s506_s27, %s1713_s1 }
 0x339   : > { %p1066_p6 = scmp.lt.u32.totalorder %s1064_s19, %s1060_s14  ;;  %p1068_p2 = scmp.lt.u32.totalorder %s1060_s14, %s506_s27 }
 0x33a   : > { %p1062_p5 = pnand %p1061_p9, %p1714_p8 }
 0x33b   : > { %p1067_p3 = por %p1066_p6, %p1065_p4 }
 0x33c   : > { %p1063_p1 = pneg %p1062_p5 }
 0x33d   : > { %p1069_p0 = por %p1068_p2, %p1067_p3 }
 0x33f   : > { %p1070_p7 = pnand %p1069_p0, %p1063_p1 }
 0x341   : > { %1073 = shalt.err (!%p1070_p7)
}
 0x342   : > { %825 = dma.vmem_to_hbm [thread:$0]  (%p1714_p8), %s1584_s5, 128, %s506_s27, %s493_s6  }
 0x343 PF: > { %p842_p13 = scmp.ge.s32.totalorder %s1188_s24, 2  ;;  %s520_s28 = sand.u32 1, %s1152_s15  }
 0x344   : > { %p1715_p12 = scmp.ne.s32.totalorder %s1698_s8, 0  ;;  %s521_s3 = scalar_lea.sflag [#allocation5], %s520_s28 }
 0x346   : > { %p838_p10 = pnand %p842_p13, %p1715_p12 }
 0x348   : > { %1135 = dma.done.wait (!%p838_p10), %s521_s3, 128  }
 0x349   : > { %1137 = vsyncadd (!%p838_p10), %s521_s3, 4294967168  ;;  %s22_s24 = sadd.s32 1, %s1188_s24   ;;  %s1717_s7 = sld [smem:[#allocation13_spill]] }
 0x34a   : > { %p1611_p11 = scmp.ge.s32.totalorder %s22_s24, 10   ;;  %s1718_s14 = sld [smem:[#allocation23_spill]] }
 0x34b   : > { %s1719_s18 = sld [smem:[#allocation17_spill]]  ;;  %s1720_s19 = sld [smem:[#allocation18_spill]] }
 0x34c   : > { %s1721_s20 = sld [smem:[#allocation19_spill]]  ;;  %s1722_s21 = sld [smem:[#allocation20_spill]] }
 0x34d   : > { %s1723_s22 = sld [smem:[#allocation21_spill]]  ;;  %s1724_s23 = sld [smem:[#allocation22_spill]] }
 0x34e   : > { %s1725_s12 = smov %s1144_s13  ;;  %s1727_s15 = smov %s1156_s16 }
 0x34f   : > { %s1726_s13 = smov %s1717_s7  ;;  %s1728_s16 = smov %s1160_s17 }
 0x350   : > { %s1729_s17 = smov %s1417_s11  ;;  %21 = sbr.rel (!%p1611_p11) target bundleno = 15 (0xf), region = 109 }
 0x357   :  { %526 = vsyncpa [#allocation4], 1 }
 0x358   :  { %528 = vsyncpa [#allocation4 + $0x1], 1 }
 0x359   :  { %529 = vsyncpa [#allocation7], 1 }
 0x35a   :  { %531 = vsyncpa [#allocation7 + $0x1], 1 }
 0x35b   :  { %532 = vsyncpa [#allocation5], 1 }
 0x35c   :  { %534 = vsyncpa [#allocation5 + $0x1], 1 }

</bundles_post_ra>
